<compile_context>
chip_gen: v5e
topology: v5e:2x2
jax: 0.10.0
libtpu: 0.0.40
codegen_flags: <defaults>
</compile_context>

<pallas_src>
import functools

import jax
import jax.numpy as jnp
from jax.experimental import pallas as pl
from jax.experimental.pallas import tpu as pltpu


def _round_up(x, m):
    return ((x + m - 1) // m) * m


def _vmem_capacity_bytes():
    try:
        return int(pltpu.get_tpu_info().vmem_capacity_bytes)
    except Exception:
        return 64 * 1024 * 1024            # conservative (v7x-sized) fallback


# ----------------------------- pass 1: ResBlock ------------------------------

def _resblock1_kernel(x_ref, rw_ref, rb_ref, h_ref, *, tile_ho):
    """num_layers == 1.  Grid = (heads, H_out tiles, N tiles).

    x_ref : (tile_n, H)        shared hidden-state row tile
    rw_ref: (H, tile_ho)  bf16 this head's weight column tile
    rb_ref: (1, tile_ho)  f32  bias tile
    h_ref : (tile_n, tile_ho)  bf16 head-transformed activations tile
    """
    y = jnp.dot(x_ref[...].astype(jnp.bfloat16), rw_ref[...],
                preferred_element_type=jnp.float32)
    y = y + rb_ref[...].astype(jnp.float32)
    start = pl.multiple_of(pl.program_id(1) * tile_ho, tile_ho)
    x_res = x_ref[:, pl.ds(start, tile_ho)].astype(jnp.float32)
    h_ref[...] = (x_res + y * jax.nn.sigmoid(y)).astype(h_ref.dtype)


def _resblockL_kernel(x_ref, rw_ref, rb_ref, h_ref, *, num_layers):
    """num_layers > 1.  Grid = (heads, N tiles); full-H weight block resident.

    x_ref : (tile_n, H)      rw_ref: (L, H, H) bf16     rb_ref: (L, 1, H) f32
    h_ref : (tile_n, H) bf16
    """
    # TODO(synk): for num_layers > 1 with very large H the (L,H,H) block can
    # exceed VMEM; a per-layer emit_pipeline over H_out would be needed there.
    x = x_ref[...].astype(jnp.float32)
    for l in range(num_layers):
        y = jnp.dot(x.astype(jnp.bfloat16), rw_ref[l],
                    preferred_element_type=jnp.float32)
        y = y + rb_ref[l].astype(jnp.float32)
        x = x + y * jax.nn.sigmoid(y)
    h_ref[...] = x.astype(h_ref.dtype)


# ----------------------------- pass 2: lm_head --------------------------------

def _lm_head_kernel(h_ref, w_ref, o_ref):
    """Grid = (V_pad // tile_v,).  (M, H) @ (H, tile_v) on the MXU.

    h_ref: (M, H)   bf16 stacked head activations (constant index -> DMA'd once)
    w_ref: (H, TV)  bf16 lm_head weight tile (streamed exactly once overall)
    o_ref: (M, TV)  lane-dense logits tile
    """
    o_ref[...] = jnp.dot(h_ref[...], w_ref[...],
                         preferred_element_type=jnp.float32).astype(o_ref.dtype)


# ----------------------------- wrapper ----------------------------------------

def medusa_heads_forward(hidden_states, res_w, res_b, lm_w, *,
                         tile_n=256, tile_ho=2048, tile_v=2048,
                         out_dtype=jnp.bfloat16):
    """hidden_states: (B, S, H)
       res_w: (heads, L, H, H)   Linear weight, already (in, out) layout
       res_b: (heads, L, H)
       lm_w : (H, V)             lm_head weight, already (in, out), no bias
       returns: (heads, B, S, V) logits in `out_dtype`
    """
    B, S, H = hidden_states.shape
    num_heads, num_layers = int(res_w.shape[0]), int(res_w.shape[1])
    V = int(lm_w.shape[1])
    N = B * S
    x_bytes = jnp.dtype(hidden_states.dtype).itemsize
    out_bytes = jnp.dtype(out_dtype).itemsize

    # Generation-aware VMEM sizing (128 MiB on v5e/v6e, 64 MiB on v7x).
    cap = _vmem_capacity_bytes()
    budget = (3 * cap) // 4        # tile-fitting budget
    limit_cap = (7 * cap) // 8     # never request more scoped VMEM than this

    # bf16 weights (halve the dominant HBM streams); biases stay f32 (tiny).
    res_w_bf = res_w.astype(jnp.bfloat16)
    res_b4 = res_b.reshape(num_heads, num_layers, 1, H).astype(jnp.float32)
    lm_w_bf = lm_w.astype(jnp.bfloat16)
    # TODO(synk): int8 (v5e/v6e) / fp8-e4m3 (v7x) lm_w streaming would ~2x pass 2.

    # ---- row (N) tiling -------------------------------------------------------
    tn = max(8, (int(tile_n) // 8) * 8)
    tn = min(tn, _round_up(N, 8))
    n_pad = _round_up(N, tn)
    x2d = hidden_states.reshape(N, H)
    if n_pad != N:
        x2d = jnp.pad(x2d, ((0, n_pad - N), (0, 0)))
    n_tiles = n_pad // tn

    # ---- pass-1 output-H tiling (only valid when num_layers == 1) -------------
    def _p1_need_tiled(t):
        return (2 * tn * H * x_bytes        # x tile (double-buffered)
                + 2 * H * t * 2             # bf16 weight tile
                + 2 * t * 4                 # bias tile
                + 2 * tn * t * 2            # bf16 output tile
                + 4 * tn * t * 4)           # f32 intermediates

    if num_layers == 1 and H % 128 == 0:
        tho = min((max(int(tile_ho), 128) // 128) * 128, H)
        while tho > 128 and (H % tho != 0 or _p1_need_tiled(tho) > budget):
            tho -= 128
    else:
        tho = H
    ho_tiles = H // tho

    if num_layers == 1:
        vmem_p1 = _p1_need_tiled(tho)
    else:
        vmem_p1 = (2 * tn * H * x_bytes + 2 * num_layers * H * H * 2
                   + 2 * num_layers * H * 4 + 2 * tn * H * 2 + 4 * tn * H * 4)
    vmem_limit_p1 = int(min(limit_cap, max(32 * 1024 * 1024, (5 * vmem_p1) // 4)))

    p1_cost = pl.CostEstimate(
        flops=2 * num_heads * num_layers * n_pad * H * H
              + 6 * num_heads * num_layers * n_pad * H,
        transcendentals=num_heads * num_layers * n_pad * H,
        bytes_accessed=num_heads * ho_tiles * n_pad * H * x_bytes
                       + num_heads * num_layers * H * H * 2
                       + num_heads * n_pad * H * 2,
    )

    if num_layers == 1:
        head_hidden = pl.pallas_call(
            functools.partial(_resblock1_kernel, tile_ho=tho),
            out_shape=jax.ShapeDtypeStruct((num_heads, n_pad, H), jnp.bfloat16),
            grid_spec=pltpu.PrefetchScalarGridSpec(
                num_scalar_prefetch=0,
                grid=(num_heads, ho_tiles, n_tiles),   # n innermost: weight tile
                in_specs=[                             # fetched once per (h, o)
                    pl.BlockSpec((tn, H), lambda h, o, n: (n, 0)),
                    pl.BlockSpec((pl.Squeezed(), pl.Squeezed(), H, tho),
                                 lambda h, o, n: (h, 0, 0, o)),
                    pl.BlockSpec((pl.Squeezed(), pl.Squeezed(), 1, tho),
                                 lambda h, o, n: (h, 0, 0, o)),
                ],
                out_specs=pl.BlockSpec((pl.Squeezed(), tn, tho),
                                       lambda h, o, n: (h, n, o)),
            ),
            compiler_params=pltpu.CompilerParams(
                dimension_semantics=("parallel", "parallel", "parallel"),
                vmem_limit_bytes=vmem_limit_p1,
            ),
            cost_estimate=p1_cost,
        )(x2d, res_w_bf, res_b4)
    else:
        head_hidden = pl.pallas_call(
            functools.partial(_resblockL_kernel, num_layers=num_layers),
            out_shape=jax.ShapeDtypeStruct((num_heads, n_pad, H), jnp.bfloat16),
            grid_spec=pltpu.PrefetchScalarGridSpec(
                num_scalar_prefetch=0,
                grid=(num_heads, n_tiles),             # n innermost: weight block
                in_specs=[                             # fetched once per head
                    pl.BlockSpec((tn, H), lambda h, n: (n, 0)),
                    pl.BlockSpec((pl.Squeezed(), num_layers, H, H),
                                 lambda h, n: (h, 0, 0, 0)),
                    pl.BlockSpec((pl.Squeezed(), num_layers, 1, H),
                                 lambda h, n: (h, 0, 0, 0)),
                ],
                out_specs=pl.BlockSpec((pl.Squeezed(), tn, H),
                                       lambda h, n: (h, n, 0)),
            ),
            compiler_params=pltpu.CompilerParams(
                dimension_semantics=("parallel", "parallel"),
                vmem_limit_bytes=vmem_limit_p1,
            ),
            cost_estimate=p1_cost,
        )(x2d, res_w_bf, res_b4)

    # ---- pass 2: shared lm_head projection over vocab tiles --------------------
    M_pad = num_heads * n_pad
    h_stacked = head_hidden.reshape(M_pad, H)    # contiguous reshape, no copy
    # TODO(synk): for prefill-sized M (heads*B*S very large) pass 2 should also
    # tile M; here the stacked activations stay resident (decode-sized M).

    def _p2_need(t):
        return (2 * M_pad * H * 2               # stacked acts (conservative x2)
                + 2 * H * t * 2                 # bf16 lm_w tile
                + 2 * M_pad * t * out_bytes     # output tile
                + M_pad * t * 4)                # f32 accumulator before cast

    tv = max(128, (min(max(int(tile_v), 128), _round_up(V, 128)) // 128) * 128)
    while tv > 128 and _p2_need(tv) > budget:
        tv -= 128
    # v7x megacore: prefer an even vocab-tile count if extra padding stays small.
    if pl.cdiv(V, tv) % 2 == 1 and pl.cdiv(V, tv) > 1:
        for tv2 in range(tv - 128, 127, -128):
            if (pl.cdiv(V, tv2) % 2 == 0
                    and pl.cdiv(V, tv2) * tv2 - V <= max(V // 8, 256)):
                tv = tv2
                break
    v_pad = pl.cdiv(V, tv) * tv
    if v_pad != V:
        lm_w_bf = jnp.pad(lm_w_bf, ((0, 0), (0, v_pad - V)))
    v_tiles = v_pad // tv

    vmem_limit_p2 = int(min(limit_cap,
                            max(32 * 1024 * 1024, (5 * _p2_need(tv)) // 4)))
    p2_cost = pl.CostEstimate(
        flops=2 * M_pad * H * v_pad,
        transcendentals=0,
        bytes_accessed=M_pad * H * 2 + H * v_pad * 2 + M_pad * v_pad * out_bytes,
    )

    logits = pl.pallas_call(
        _lm_head_kernel,
        out_shape=jax.ShapeDtypeStruct((M_pad, v_pad), out_dtype),
        grid_spec=pltpu.PrefetchScalarGridSpec(
            num_scalar_prefetch=0,
            grid=(v_tiles,),
            in_specs=[
                pl.BlockSpec((M_pad, H), lambda v: (0, 0)),   # DMA'd once
                pl.BlockSpec((H, tv), lambda v: (0, v)),      # streamed once
            ],
            out_specs=pl.BlockSpec((M_pad, tv), lambda v: (0, v)),
        ),
        compiler_params=pltpu.CompilerParams(
            dimension_semantics=("parallel",),
            vmem_limit_bytes=vmem_limit_p2,
        ),
        cost_estimate=p2_cost,
    )(h_stacked, lm_w_bf)

    logits = logits.reshape(num_heads, n_pad, v_pad)
    if v_pad != V:
        logits = logits[:, :, :V]
    if n_pad != N:
        logits = logits[:, :N, :]
    return logits.reshape(num_heads, B, S, V)


# ----------------------------- reference --------------------------------------

def _reference_mirror(hidden_2d, res_w, res_b, lm_w, out_dtype):
    """Plain-JAX reference mirroring the kernel's dtype flow exactly
    (bf16 matmul operands, f32 accumulation/residual, bf16 activation
    round-trip between the two passes, `out_dtype` logits)."""
    num_heads, num_layers = res_w.shape[0], res_w.shape[1]
    rw = res_w.astype(jnp.bfloat16)
    lw = lm_w.astype(jnp.bfloat16)
    outs = []
    for h in range(num_heads):
        x = hidden_2d.astype(jnp.float32)
        for l in range(num_layers):
            y = jnp.dot(x.astype(jnp.bfloat16), rw[h, l],
                        preferred_element_type=jnp.float32)
            y = y + res_b[h, l].astype(jnp.float32)
            x = x + y * jax.nn.sigmoid(y)
        x = x.astype(jnp.bfloat16)
        outs.append(jnp.dot(x, lw,
                            preferred_element_type=jnp.float32).astype(out_dtype))
    return jnp.stack(outs, axis=0)


if __name__ == "__main__":
    # Small, MXU-friendly synthetic shapes.
    B, S, H, V = 2, 8, 256, 1024
    NUM_HEADS = 4

    key = jax.random.PRNGKey(0)
    k_h, k_w, k_b, k_lm, k_w2, k_b2 = jax.random.split(key, 6)

    hidden_states = jax.random.normal(k_h, (B, S, H), dtype=jnp.float32)
    lm_w = 0.05 * jax.random.normal(k_lm, (H, V), dtype=jnp.float32)   # (in, out)

    # (The original __init__ zero-inits the ResBlock linear weight; small random
    # weights are used so the matmul path is exercised — semantics unchanged.)

    # ---- num_layers == 1 (original default): H_out-tiled ResBlock path ------
    res_w1 = 0.05 * jax.random.normal(k_w, (NUM_HEADS, 1, H, H), dtype=jnp.float32)
    res_b1 = 0.05 * jax.random.normal(k_b, (NUM_HEADS, 1, H), dtype=jnp.float32)
    logits1 = medusa_heads_forward(hidden_states, res_w1, res_b1, lm_w,
                                   tile_n=8, tile_ho=128, tile_v=512,
                                   out_dtype=jnp.float32)
    logits1 = jax.block_until_ready(logits1)
    ref1 = _reference_mirror(hidden_states.reshape(B * S, H), res_w1, res_b1,
                             lm_w, jnp.float32).reshape(NUM_HEADS, B, S, V)
    assert logits1.shape == (NUM_HEADS, B, S, V)
    assert jnp.allclose(logits1, ref1, atol=2e-2, rtol=2e-2), (
        float(jnp.max(jnp.abs(logits1 - ref1))))

    # ---- num_layers == 2, default tiles, bf16 logits -------------------------
    res_w2 = 0.05 * jax.random.normal(k_w2, (NUM_HEADS, 2, H, H), dtype=jnp.float32)
    res_b2 = 0.05 * jax.random.normal(k_b2, (NUM_HEADS, 2, H), dtype=jnp.float32)
    logits2 = medusa_heads_forward(hidden_states, res_w2, res_b2, lm_w)
    logits2 = jax.block_until_ready(logits2)
    ref2 = _reference_mirror(hidden_states.reshape(B * S, H), res_w2, res_b2,
                             lm_w, jnp.bfloat16).reshape(NUM_HEADS, B, S, V)
    assert logits2.shape == (NUM_HEADS, B, S, V)
    d2 = jnp.max(jnp.abs(logits2.astype(jnp.float32) - ref2.astype(jnp.float32)))
    assert jnp.allclose(logits2.astype(jnp.float32), ref2.astype(jnp.float32),
                        atol=6e-2, rtol=6e-2), float(d2)

    # TODO(synk): the frozen base LLM (base_model.model), tokenizer and the
    # medusa_generate tree-decoding loop are not expressible as a single kernel;
    # these kernels cover the Medusa-head + lm_head hot path.
    print("KERNEL_OK")
</pallas_src>

<mosaic_0001>
module attributes {stable_mosaic.version = 11 : i64} {
  func.func @_resblock1_kernel(%arg0: i32, %arg1: i32, %arg2: i32, %arg3: memref<8x256xf32, #tpu.memory_space<vmem>>, %arg4: memref<1x1x256x128xbf16, #tpu.memory_space<vmem>>, %arg5: memref<1x1x1x128xf32, #tpu.memory_space<vmem>>, %arg6: memref<1x8x128xbf16, #tpu.memory_space<vmem>>) attributes {dimension_semantics = [#tpu.dimension_semantics<parallel>, #tpu.dimension_semantics<parallel>, #tpu.dimension_semantics<parallel>], iteration_bounds = array<i64: 4, 2, 2>, scalar_prefetch = 0 : i64, scratch_operands = 0 : i64, tpu.core_type = #tpu.core_type<tc>, window_params = [{transform_indices = @transform_0, window_bounds = array<i64: 8, 256>}, {transform_indices = @transform_1, window_bounds = array<i64: 1, 1, 256, 128>}, {transform_indices = @transform_2, window_bounds = array<i64: 1, 1, 1, 128>}, {transform_indices = @transform_3, window_bounds = array<i64: 1, 8, 128>}]} {
    %c0 = arith.constant 0 : index
    %c0_0 = arith.constant 0 : index
    %0 = vector.load %arg3[%c0, %c0_0] : memref<8x256xf32, #tpu.memory_space<vmem>>, vector<8x256xf32>
    %1 = arith.truncf %0 : vector<8x256xf32> to vector<8x256xbf16>
    %c0_1 = arith.constant 0 : index
    %c0_2 = arith.constant 0 : index
    %c0_3 = arith.constant 0 : index
    %c0_4 = arith.constant 0 : index
    %2 = vector.load %arg4[%c0_1, %c0_2, %c0_3, %c0_4] : memref<1x1x256x128xbf16, #tpu.memory_space<vmem>>, vector<1x1x256x128xbf16>
    %3 = vector.shape_cast %2 : vector<1x1x256x128xbf16> to vector<256x128xbf16>
    %cst = arith.constant dense<0.000000e+00> : vector<8x128xf32>
    %4 = tpu.matmul %1, %3, %cst {dimension_numbers = #tpu.dot_dimension_numbers<[1], [0], [0], [1], [0, 0, 1, 1], [], []>} : vector<8x256xbf16>, vector<256x128xbf16>, vector<8x128xf32> -> vector<8x128xf32>
    %c0_5 = arith.constant 0 : index
    %c0_6 = arith.constant 0 : index
    %c0_7 = arith.constant 0 : index
    %c0_8 = arith.constant 0 : index
    %5 = vector.load %arg5[%c0_5, %c0_6, %c0_7, %c0_8] : memref<1x1x1x128xf32, #tpu.memory_space<vmem>>, vector<1x1x1x128xf32>
    %6 = vector.shape_cast %5 : vector<1x1x1x128xf32> to vector<1x128xf32>
    %7 = vector.broadcast %6 : vector<1x128xf32> to vector<8x128xf32>
    %8 = arith.addf %4, %7 : vector<8x128xf32>
    %c128_i32 = arith.constant 128 : i32
    %9 = arith.muli %arg1, %c128_i32 : i32
    %10 = tpu.assume_multiple %9, 128 : i32
    %c0_9 = arith.constant 0 : index
    %11 = arith.index_cast %10 : i32 to index
    %12 = vector.load %arg3[%c0_9, %11] : memref<8x256xf32, #tpu.memory_space<vmem>>, vector<8x128xf32>
    %13 = arith.negf %8 : vector<8x128xf32>
    %14 = math.exp %13 : vector<8x128xf32>
    %cst_10 = arith.constant 1.000000e+00 : f32
    %15 = vector.broadcast %cst_10 : f32 to vector<8x128xf32>
    %16 = arith.addf %15, %14 : vector<8x128xf32>
    %17 = arith.divf %15, %16 : vector<8x128xf32>
    %18 = arith.mulf %8, %17 : vector<8x128xf32>
    %19 = arith.addf %12, %18 : vector<8x128xf32>
    %20 = arith.truncf %19 : vector<8x128xf32> to vector<8x128xbf16>
    %c0_11 = arith.constant 0 : index
    %c0_12 = arith.constant 0 : index
    %c0_13 = arith.constant 0 : index
    %21 = vector.load %arg6[%c0_11, %c0_12, %c0_13] : memref<1x8x128xbf16, #tpu.memory_space<vmem>>, vector<1x8x128xbf16>
    %22 = vector.shape_cast %21 : vector<1x8x128xbf16> to vector<8x128xbf16>
    %23 = vector.shape_cast %20 : vector<8x128xbf16> to vector<1x8x128xbf16>
    tpu.vector_store %arg6[%c0_11, %c0_12, %c0_13], %23 {strides = array<i32>} : memref<1x8x128xbf16, #tpu.memory_space<vmem>>, vector<1x8x128xbf16>,
    return
  }
  func.func @transform_0(%arg0: i32, %arg1: i32, %arg2: i32) -> (i32, i32) {
    %c0_i32 = arith.constant 0 : i32
    %c0_i32_0 = arith.constant 0 : i32
    return %arg2, %c0_i32 : i32, i32
  }
  func.func @transform_1(%arg0: i32, %arg1: i32, %arg2: i32) -> (i32, i32, i32, i32) {
    %c0_i32 = arith.constant 0 : i32
    %c0_i32_0 = arith.constant 0 : i32
    %c0_i32_1 = arith.constant 0 : i32
    return %arg0, %c0_i32, %c0_i32_0, %arg1 : i32, i32, i32, i32
  }
  func.func @transform_2(%arg0: i32, %arg1: i32, %arg2: i32) -> (i32, i32, i32, i32) {
    %c0_i32 = arith.constant 0 : i32
    %c0_i32_0 = arith.constant 0 : i32
    %c0_i32_1 = arith.constant 0 : i32
    return %arg0, %c0_i32, %c0_i32_0, %arg1 : i32, i32, i32, i32
  }
  func.func @transform_3(%arg0: i32, %arg1: i32, %arg2: i32) -> (i32, i32, i32) {
    %c0_i32 = arith.constant 0 : i32
    return %arg0, %arg2, %arg1 : i32, i32, i32
  }
}

</mosaic_0001>

<bundles_post_ra>
// kernel: tpu_custom_call.1
= control target key start
LH: loop header
LB: loop body
LE: loop exit
PB: predicated region body
PF: predicated region fallthrough
CT: control target
= control target key end

     0   :  { %s1502_s0 = inlined_call_operand.hbm [shape: f32[16,256], index: 0, kind: input, shape index: {}]   ;;  %s1503_s1 = inlined_call_operand.hbm [shape: bf16[4,1,256,256], index: 1, kind: input, shape index: {}]   ;;  %s1504_s2 = inlined_call_operand.hbm [shape: f32[4,1,1,256], index: 2, kind: input, shape index: {}]   ;;  %s1505_s3 = inlined_call_operand.hbm [shape: bf16[4,16,256], index: 3, kind: output, shape index: {}]  }
   0x1   :  { %1519 = sst [smem:[#allocation27_spill]] %s1503_s1 }
   0x2   :  { %1520 = sst [smem:[#allocation28_spill]] %s1505_s3 }
   0x3   :  { %8 = vsyncpa [#allocation3], 0 }
   0x4   :  { %10 = vsyncpa [#allocation3 + $0x1], 0 }
   0x5   :  { %11 = vsyncpa [#allocation6], 0 }
   0x6   :  { %13 = vsyncpa [#allocation6 + $0x1], 0 }
   0x7   :  { %14 = vsyncpa [#allocation4], 0 }
   0x8   :  { %16 = vsyncpa [#allocation4 + $0x1], 0  ;;  %s1186_s12 = smov 0   ;;  %s1188_s13 = smov 0  }
   0x9   :  { %s1190_s14 = smov 0   ;;  %s1192_s15 = smov 0  }
   0xa   :  { %s1194_s16 = smov 0   ;;  %s1196_s17 = smov 0  }
   0xb   :  { %s1198_s18 = smov 0   ;;  %s1200_s19 = smov 0  }
   0xc   :  { %s1202_s20 = smov 0   ;;  %s1204_s21 = smov 0  }
   0xd   :  { %s1206_s22 = smov 0   ;;  %s1208_s23 = smov 0  }
   0xe   :  { %s1210_s24 = smov 0   ;;  %s1212_s25 = smov 0  }
   0xf   :  { %s1214_s26 = smov 0   ;;  %s1216_s27 = smov 0  }
  0x10 LB: > { %1521 = sst [smem:[#allocation12_spill]] %s1101_s12  ;;  %p56_p0 = scmp.eq.s32.totalorder %s1161_s27, 0  ;;  %s1161_s27 = sphi %s1216_s27, %s22_s27   ;;  %s1157_s26 = sphi %s1214_s26, %s1577_s26   ;;  %s1153_s25 = sphi %s1212_s25, %s1576_s25   ;;  %s1149_s24 = sphi %s1210_s24, %s1575_s24   ;;  %s1145_s23 = sphi %s1208_s23, %s1574_s23   ;;  %s1141_s22 = sphi %s1206_s22, %s1573_s22   ;;  %s1137_s21 = sphi %s1204_s21, %s1561_s21   ;;  %s1133_s20 = sphi %s1202_s20, %s1572_s20   ;;  %s1129_s19 = sphi %s1200_s19, %s1571_s19   ;;  %s1125_s18 = sphi %s1198_s18, %s1570_s18   ;;  %s1121_s17 = sphi %s1196_s17, %s1569_s17   ;;  %s1117_s16 = sphi %s1194_s16, %s1568_s16   ;;  %s1113_s15 = sphi %s1192_s15, %s1557_s15   ;;  %s1109_s14 = sphi %s1190_s14, %s1567_s14   ;;  %s1105_s13 = sphi %s1188_s13, %s1566_s13   ;;  %s1101_s12 = sphi %s1186_s12, %s1565_s12  }
  0x11   : > { %1522 = sst [smem:[#allocation13_spill]] %s1109_s14  ;;  %p83_p1 = scmp.ne.s32.totalorder %s1121_s17, %s1117_s16 }
  0x12   : > { %1523 = sst [smem:[#allocation14_spill]] %s1117_s16  ;;  %p767_p2 = scmp.lt.s32.totalorder %s1161_s27, 16 }
  0x13   : > { %1524 = sst [smem:[#allocation15_spill]] %s1133_s20  ;;  %p85_p3 = por %p83_p1, %p56_p0 }
  0x14   : > { %1525 = sst [smem:[#allocation16_spill]] %s1137_s21  ;;  %s191_s28 = sand.u32 1, %s1161_s27  }
  0x15   : > { %1526 = sst [smem:[#allocation17_spill]] %s1141_s22  ;;  %s1507_s29 = sand.u32 1, %s1121_s17  }
  0x16   : > { %1527 = sst [smem:[#allocation18_spill]] %s1145_s23  ;;  %s647_s30 = sshll.u32 %s1507_s29, 7 }
  0x17   : > { %1528 = sst [smem:[#allocation19_spill]] %s1149_s24  ;;  %s648_s4 = sshll.u32 %s1157_s26, 6 }
  0x18   : > { %s199_s5 = sadd.s32 %s1153_s25, %s648_s4  ;;  %s195_s7 = scalar_lea.vmem [#allocation5], %s647_s30 }
  0x19   : > { %s649_s6 = sshll.u32 %s199_s5, 2  ;;  %s204_s8 = sshll.u32 %s195_s7, 4  ;;  %s205_s8 = int_to_ptr.vmem [resolvable:$true] %s204_s8 }
  0x1a   : > { %s1529_s1 = sld [smem:[#allocation27_spill]]  ;;  %p1283_p4 = pnand %p767_p2, %p85_p3 }
  0x1b   : > { %p651_p5 = scmp.ge.s32.totalorder %s1161_s27, 1  ;;  %s1288_s30 = scalar_lea.sflag [#allocation6], %s191_s28 }
  0x1c   : > { %s1163_s4 = smov 128   ;;  %s1164_s5 = smov 64  }
  0x1d   : > { %p231_p6 = scmp.lt.s32.totalorder %s1161_s27, 17  ;;  %s1299_s9 = sadd.s32 4294967295, %s1161_s27  }
  0x1e   : > { %s34_s10 = sadd.s32 1, %s1149_s24  ;;  %p55_p9 = scmp.ne.s32.totalorder %s1133_s20, %s1129_s19 }
  0x1f   : > { %p1294_p7 = pnand %p651_p5, %p231_p6  ;;  %p35_p8 = scmp.ge.s32.totalorder %s34_s10, 2 }
  0x20   : > { %s201_s11 = scalar_lea.hbm %s1529_s1, %s649_s6  ;;  %s1165_s6 = smov 4  }
  0x21   : > { %s202_s3 = sshll.u32 %s201_s11, 4  ;;  %s37_s11 = sadd.s32 1, %s1153_s25  ;;  %s203_s3 = int_to_ptr.hbm [resolvable:$true] %s202_s3 }
  0x22   : > { %759 = dma.hbm_to_vmem [thread:$0]  (!%p1283_p4), %s203_s3, 2048, %s205_s8, %s1288_s30, %s1163_s4, %s1164_s5, %s1165_s6  }
  0x23   : > { %s41_s1 = sadd.s32 1, %s1157_s26  ;;  %s48_s3 = sadd.s32 1, %s1133_s20 }
  0x24   : > { %s1579_s10 = smov (%p35_p8, %s34_s10), 0  ;;  %s1581_s11 = smov (!%p35_p8, %s37_s11), %s1153_s25 }
  0x25   : > { %1532 = sst [smem:[#allocation20_spill]] %s1579_s10  ;;  %s45_s8 = ssub.s32 %s1149_s24, %s1579_s10 }
  0x26   : > { %p1315_p10 = por %p56_p0, %p55_p9  ;;  %p39_p11 = scmp.ge.s32.totalorder %s1581_s11, 2 }
  0x27   : > { %p46_p12 = scmp.eq.s32.totalorder %s45_s8, 0  ;;  %p61_p13 = scmp.ne.s32.totalorder %s1129_s19, %s1125_s18 }
  0x28   : > { %p62_p1 = scmp.eq.s32.totalorder %s1299_s9, 0  ;;  %s1583_s11 = smov (%p39_p11, %s1581_s11), 0 }
  0x29   : > { %1534 = sst [smem:[#allocation21_spill]] %s1583_s11  ;;  %s1585_s1 = smov (!%p39_p11, %s41_s1), %s1157_s26 }
  0x2a   : > { %s1326_s5 = scalar_select %p46_p12, %s1133_s20, %s48_s3  }
  0x2b   : > { %p43_p3 = scmp.ge.s32.totalorder %s1585_s1, 4  ;;  %p1330_p0 = por %p62_p1, %p61_p13 }
  0x2c   : > { %1535 = sst [smem:[#allocation22_spill]] %s1326_s5  ;;  %s72_s28 = ssub.s32 %s1153_s25, %s1583_s11 }
  0x2d   : > { %s76_s10 = sadd.s32 1, %s1121_s17  ;;  %s1587_s1 = smov (%p43_p3, %s1585_s1), 0 }
  0x2e   : > { %1537 = sst [smem:[#allocation23_spill]] %s1587_s1  ;;  %p89_p5 = scmp.ne.s32.totalorder %s1117_s16, %s1113_s15 }
  0x2f   : > { %s134_s18 = sadd.s32 1, %s1109_s14  ;;  %s71_s3 = ssub.s32 %s1157_s26, %s1587_s1 }
  0x30   : > { %p144_p6 = scmp.ne.s32.totalorder %s1109_s14, %s1105_s13  ;;  %s73_s5 = sor.u32 %s72_s28, %s71_s3 }
  0x31   : > { %p1348_p8 = por %p89_p5, %p62_p1  ;;  %p74_p9 = scmp.eq.s32.totalorder %s73_s5, 0 }
  0x32   : > { %s129_s11 = sor.u32 %s71_s3, %s45_s8  ;;  %p145_p11 = scmp.eq.s32.totalorder %s1299_s9, 15 }
  0x33   : > { %s131_s22 = sor.u32 %s129_s11, %s72_s28  ;;  %p150_p3 = scmp.ne.s32.totalorder %s1105_s13, %s1101_s12 }
  0x34   : > { %s1354_s21 = scalar_select %p74_p9, %s1121_s17, %s76_s10  }
  0x35   : > { %p132_p12 = scmp.eq.s32.totalorder %s131_s22, 0  ;;  %p1356_p13 = por %p145_p11, %p144_p6 }
  0x36   : > { %1539 = sst [smem:[#allocation24_spill]] %s1354_s21  ;;  %s1542_s1 = sadd.s32 4294967294, %s1161_s27  }
  0x37   : > { %s1540_s15 = scalar_select %p1356_p13, 1, 0 }
  0x38   : > { %p151_p1 = scmp.eq.s32.totalorder %s1542_s1, 15  ;;  %s171_s28 = sand.u32 1, %s1133_s20  }
  0x39   : > { %1541 = sst [smem:[#allocation25_spill]] %s1540_s15  ;;  %s644_s10 = sshll.u32 %s171_s28, 4 }
  0x3a   : > { %s1365_s16 = scalar_select %p132_p12, %s1109_s14, %s134_s18  }
  0x3b   : > { %p1367_p5 = por %p151_p1, %p150_p3  ;;  %s728_s11 = sshll.u32 %s1149_s24, 4 }
  0x3c   : > { %1543 = sst [smem:[#allocation26_spill]] %s1365_s16  ;;  %s180_s3 = scalar_lea.hbm %s1502_s0, %s728_s11 }
  0x3d   : > { %s175_s21 = scalar_lea.vmem [#allocation2], %s644_s10  ;;  %s182_s15 = sshll.u32 %s180_s3, 4  ;;  %s183_s15 = int_to_ptr.hbm [resolvable:$true] %s182_s15 }
  0x3e   : > { %s184_s12 = sshll.u32 %s175_s21, 4  ;;  %p754_p6 = pnand %p767_p2, %p1315_p10  ;;  %s185_s12 = int_to_ptr.vmem [resolvable:$true] %s184_s12 }
  0x3f   : > { %s650_s1 = sshll.u32 %s1157_s26, 1  ;;  %s172_s16 = scalar_lea.sflag [#allocation3], %s171_s28 }
  0x40   : > { %s221_s18 = sadd.s32 %s1153_s25, %s650_s1  ;;  %s1545_s22 = sand.u32 1, %s1121_s17  }
  0x41   : > { %756 = dma.hbm_to_vmem [thread:$0]  (!%p754_p6), %s183_s15, 256, %s185_s12, %s172_s16  }
  0x42   : > { %s222_s14 = scalar_lea.hbm %s1504_s2, %s221_s18  ;;  %s217_s11 = scalar_lea.vmem [#allocation7], %s1545_s22 }
  0x43   : > { %s226_s10 = sshll.u32 %s217_s11, 4  ;;  %s224_s5 = sshll.u32 %s222_s14, 4  ;;  %s227_s10 = int_to_ptr.vmem [resolvable:$true] %s226_s10  ;;  %s225_s5 = int_to_ptr.hbm [resolvable:$true] %s224_s5 }
  0x44   : > { %762 = dma.hbm_to_vmem [thread:$0]  (!%p1283_p4), %s225_s5, 16, %s227_s10, %s1288_s30  }
  0x45   : > { %235 = sbr.rel (%p1294_p7) target bundleno = 284 (0x11c), region = 32  ;;  %s237_s21 = sand.u32 (!%p1294_p7), 1, %s1129_s19  }
  0x46   : > { %s652_s4 = sshll.u32 (!%p1294_p7), %s237_s21, 4  ;;  %s238_s12 = scalar_lea.sflag (!%p1294_p7), [#allocation3], %s237_s21 }
  0x47   : > { %s1393_s16 = scalar_lea.vmem (!%p1294_p7), [#allocation2], %s652_s4 }
  0x4a   : > { %1088 = dma.done.wait (%p1330_p0), %s238_s12, 256  }
  0x4b   : > { %1090 = vsyncadd (%p1330_p0), %s238_s12, 4294967040  ;;  %s1546_s14 = sld [smem:[#allocation14_spill]]  ;;  %s247_s20 = sand.u32 1, %s1299_s9  }
  0x4c   : > { %s248_s30 = scalar_lea.sflag [#allocation6], %s247_s20 }
  0x51   : > { %s249_s24 = sand.u32 1, %s1546_s14  }
  0x52   : > { %s653_s29 = sshll.u32 %s249_s24, 7 }
  0x53   : > { %s1401_s7 = scalar_lea.vmem [#allocation5], %s653_s29 }
  0x54   : > { %1092 = dma.done.wait (%p1348_p8), %s248_s30, 2064  }
  0x55   : > { %1094 = vsyncadd (%p1348_p8), %s248_s30, 4294965232  ;;  %v736_v0 = vld [vmem:[%s1401_s7 + $0x38] sm:$0xff]  ;;  %v735_v2 = vld [vmem:[%s1401_s7 + $0x30] sm:$0xff]  ;;  %s260_s23 = scalar_lea.vmem [#allocation7], %s249_s24  ;;  %s1547_s9 = sld [smem:[#allocation16_spill]] }
  0x56   : > { %v744_v1 = vld [vmem:[%s1401_s7 + $0x78] sm:$0xff]  ;;  %429 = vmatpush.bf16.msra.mxu0 %v736_v0  ;;  %v743_v3 = vld [vmem:[%s1401_s7 + $0x70] sm:$0xff]  ;;  %v734_v4 = vld [vmem:[%s1401_s7 + $0x28] sm:$0xff]  ;;  %s1548_s6 = sld [smem:[#allocation17_spill]]  ;;  %s290_s11 = sand.u32 1, %s1105_s13  }
  0x57   : > { %442 = vmatpush.bf16.msra.mxu1 %v744_v1  ;;  %v742_v5 = vld [vmem:[%s1401_s7 + $0x68] sm:$0xff]  ;;  %v733_v6 = vld [vmem:[%s1401_s7 + $0x20] sm:$0xff]  ;;  %v732_v8 = vld [vmem:[%s1401_s7 + $0x18] sm:$0xff]  ;;  %s1549_s15 = sld [smem:[#allocation18_spill]]  ;;  %s654_s21 = sshll.u32 %s290_s11, 2 }
  0x58   : > { %v741_v7 = vld [vmem:[%s1401_s7 + $0x60] sm:$0xff]  ;;  %v740_v9 = vld [vmem:[%s1401_s7 + $0x58] sm:$0xff]  ;;  %v731_v10 = vld [vmem:[%s1401_s7 + $0x10] sm:$0xff]  ;;  %s1550_s24 = sld [smem:[#allocation28_spill]] }
  0x59   : > { %v739_v11 = vld [vmem:[%s1401_s7 + $0x50] sm:$0xff]  ;;  %v730_v12 = vld [vmem:[%s1401_s7 + $0x8] sm:$0xff]  ;;  %v729_v14 = vld [vmem:[%s1401_s7] sm:$0xff] }
  0x5a   : > { %430 = vmatpush.bf16.msra.mxu0 %v735_v2  ;;  %v738_v13 = vld [vmem:[%s1401_s7 + $0x48] sm:$0xff]  ;;  %v737_v15 = vld [vmem:[%s1401_s7 + $0x40] sm:$0xff] }
  0x5b   : > { %443 = vmatpush.bf16.msra.mxu1 %v743_v3  ;;  %v293_v16 = vld [vmem:[%s1393_s16] sm:$0xff]  ;;  %v294_v17 = vld [vmem:[%s1393_s16 + $0x8] sm:$0xff]  ;;  %s723_s28 = sshll.u32 %s1547_s9, 1 }
  0x5c   : > { %v295_v18 = vpack.c.bf16 %v293_v16, %v293_v16  ;;  %v296_v19 = vpack.c.bf16 %v294_v17, %v294_v17  ;;  %v900_v20 = vld [vmem:[%s260_s23] ss:$0 sm:$0xff]  ;;  %s719_s3 = sshll.u32 %s1548_s6, 7  ;;  %s495_s1 = sadd.s32 %s1548_s6, %s723_s28 }
  0x5d   : > { %s724_s18 = sshll.u32 %s1549_s15, 2  ;;  %s456_s22 = sshra.s32 %s719_s3, 7 }
  0x5e   : > { %431 = vmatpush.bf16.msra.mxu0 %v734_v4  ;;  %s497_s10 = sadd.s32 %s724_s18, %s495_s1  ;;  %s720_s5 = sshll.u32 %s456_s22, 3 }
  0x5f   : > { %444 = vmatpush.bf16.msra.mxu1 %v742_v5  ;;  %s725_s4 = sshll.u32 %s497_s10, 2  ;;  %s459_s12 = scalar_lea.vmem %s1393_s16, %s720_s5 [#allocation2] }
  0x60   : > { %s1551_s29 = smov %s1550_s24  ;;  %s499_s30 = scalar_lea.hbm %s1550_s24, %s725_s4  ;;  %v460_v39 = vld [vmem:[%s459_s12] sm:$0xff] }
  0x61   : > { %s292_s23 = scalar_lea.vmem [#allocation8], %s654_s21  ;;  %s503_s6 = sshll.u32 %s499_s30, 4  ;;  %s504_s6 = int_to_ptr.hbm [resolvable:$true] %s503_s6 }
  0x62   : > { %432 = vmatpush.bf16.msra.mxu0 %v733_v6  ;;  %s501_s9 = sshll.u32 %s292_s23, 4  ;;  %s485_s16 = scalar_lea.sflag [#allocation4], %s290_s11  ;;  %s502_s9 = int_to_ptr.vmem [resolvable:$true] %s501_s9 }
  0x63   : > { %445 = vmatpush.bf16.msra.mxu1 %v741_v7  ;;  %s1009_s15 = sshra.s32 %s504_s6, 4  ;;  %s1015_s18 = scalar_lea.hbm %s1551_s29, 64  ;;  %s1010_s15 = int_to_ptr.hbm [resolvable:$true] %s1009_s15 }
  0x64   : > { %s1011_s28 = scalar_lea.hbm %s1010_s15, 4  ;;  %p1016_p10 = scmp.lt.s32.totalorder %s1010_s15, %s1551_s29 }
  0x65   : > { %p1012_p2 = scmp.ne.s32.totalorder %s1010_s15, %s1011_s28  ;;  %p1017_p0 = scmp.lt.s32.totalorder %s1015_s18, %s1011_s28 }
  0x66   : > { %433 = vmatpush.bf16.msra.mxu0 %v732_v8 }
  0x67   : > { %446 = vmatpush.bf16.msra.mxu1 %v740_v9  ;;  %p1013_p4 = pnand %p1012_p2, %p1356_p13  ;;  %p1018_p8 = por %p1017_p0, %p1016_p10 }
  0x69   : > { %p1014_p7 = pneg %p1013_p4 }
  0x6a   : > { %434 = vmatpush.bf16.msra.mxu0 %v731_v10 }
  0x6b   : > { %447 = vmatpush.bf16.msra.mxu1 %v739_v11  ;;  %p1019_p9 = pnand %p1018_p8, %p1014_p7 }
  0x6e   : > { %435 = vmatpush.bf16.msra.mxu0 %v730_v12 }
  0x6f   : > { %448 = vmatpush.bf16.msra.mxu1 %v738_v13 }
  0x72   : > { %436 = vmatpush.bf16.msra.mxu0 %v729_v14 }
  0x73   : > { %449 = vmatpush.bf16.msra.mxu1 %v737_v15 }
  0x75   : > { %437 = vmatmul.bf16.vlgmr.msra.gmra.mxu0 %v295_v18 }
  0x76   : > { %450 = vmatmul.bf16.vlgmr.msra.gmra.mxu1 %v296_v19 }
  0xf2   : > { %v438_v21 = vpop.f32.mrf.mxu0 }
  0xf3   : > { %v451_v22 = vpop.f32.mrf.mxu1  ;;  %v439_v23 = vadd.f32 %v900_v20, %v438_v21 }
  0xf5   : > { %v452_v24 = vadd.f32 %v451_v22, %v439_v23 }
  0xf7   : > { %v721_v25 = vmul.f32 -1.442695, %v452_v24 }
  0xf9   : > { %901 = vpow2.f32 %v721_v25 }
  0xfa   : > { %v440_v26 = vpop.f32.mrf.mxu0 }
  0xfb   : > { %v453_v27 = vpop.f32.mrf.mxu1 }
  0xff   : > { %v902_v28 = vpop.eup %901 }
 0x100   : > { %v464_v29 = vadd.f32 1.0, %v902_v28 }
 0x102   : > { %903 = vrcp.f32 %v464_v29  ;;  %v476_v33 = vand.u32 2147483648, %v464_v29  ;;  %v474_v35 = vand.u32 2147483647, %v464_v29  ;;  %vm470_vm1 = vweird.f32 %v464_v29 }
 0x104   : > { %v477_v37 = vor.u32 1.1754944e-38, %v476_v33  ;;  %vm475_vm3 = vcmp.eq.f32.partialorder %v474_v35, 8.507059e+37 }
 0x108   : > { %v904_v30 = vpop.eup %903 }
 0x109   : > { %v466_v31 = vmul.f32 %v904_v30, %v464_v29  ;;  %vm471_vm0 = vweird.f32 %v904_v30 }
 0x10a   : > { %vm472_vm2 = vmor %vm470_vm1, %vm471_vm0 }
 0x10b   : > { %v467_v32 = vsub.f32 1.0, %v466_v31 }
 0x10d   : > { %v468_v34 = vmul.f32 %v904_v30, %v467_v32 }
 0x10f   : > { %v469_v36 = vadd.f32 %v904_v30, %v468_v34 }
 0x111   : > { %v473_v38 = vsel %vm472_vm2, %v904_v30, %v469_v36 }
 0x112   : > { %v478_v40 = vsel %vm475_vm3, %v477_v37, %v473_v38 }
 0x113   : > { %v480_v41 = vmul.f32 %v478_v40, %v452_v24 }
 0x115   : > { %v481_v42 = vadd.f32 %v480_v41, %v460_v39 }
 0x117   : > { %v482_v43 = vpack.c.bf16 %v481_v42, %v481_v42 }
 0x119   : > { %483 = vst [vmem:[%s292_s23] sm:$0xf] %v482_v43 }
 0x11a   : > { %1022 = shalt.err (!%p1019_p9)
}
 0x11b   : > { %751 = dma.vmem_to_hbm [thread:$0]  (%p1356_p13), %s502_s9, 64, %s504_s6, %s485_s16  }
 0x11c PF: > { %s1553_s11 = sld [smem:[#allocation12_spill]]  ;;  %p768_p11 = scmp.ge.s32.totalorder %s1161_s27, 2 }
 0x11e   : > { %p764_p12 = pnand %p768_p11, %p1367_p5 }
 0x120   : > { %p765_p3 = pneg %p764_p12 }
 0x122   : > { %s515_s5 = sand.u32 1, %s1553_s11  }
 0x123   : > { %s516_s21 = scalar_lea.sflag [#allocation4], %s515_s5 }
 0x124   : > { %1096 = dma.done.wait (%p765_p3), %s516_s21, 64  }
 0x125   : > { %1098 = vsyncadd (%p765_p3), %s516_s21, 4294967232  ;;  %s22_s27 = sadd.s32 1, %s1161_s27   ;;  %s1555_s14 = sld [smem:[#allocation13_spill]] }
 0x126   : > { %p1449_p1 = scmp.ge.s32.totalorder %s22_s27, 18   ;;  %s1556_s20 = sld [smem:[#allocation26_spill]] }
 0x127   : > { %s1557_s15 = sld [smem:[#allocation14_spill]]  ;;  %s1565_s12 = smov %s1105_s13 }
 0x128   : > { %s1558_s24 = sld [smem:[#allocation24_spill]]  ;;  %s1568_s16 = smov %s1121_s17 }
 0x129   : > { %s1559_s30 = sld [smem:[#allocation15_spill]]  ;;  %s1570_s18 = smov %s1129_s19 }
 0x12a   : > { %s1560_s8 = sld [smem:[#allocation22_spill]]  ;;  %s1573_s22 = smov %s1153_s25 }
 0x12b   : > { %s1561_s21 = sld [smem:[#allocation19_spill]]  ;;  %s1566_s13 = smov %s1555_s14 }
 0x12c   : > { %s1562_s7 = sld [smem:[#allocation20_spill]]  ;;  %s1567_s14 = smov %s1556_s20 }
 0x12d   : > { %s1563_s9 = sld [smem:[#allocation21_spill]]  ;;  %s1574_s23 = smov %s1157_s26 }
 0x12e   : > { %s1564_s6 = sld [smem:[#allocation23_spill]]  ;;  %s1569_s17 = smov %s1558_s24 }
 0x12f   : > { %s1571_s19 = smov %s1559_s30 }
 0x130   : > { %s1572_s20 = smov %s1560_s8  ;;  %21 = sbr.rel (!%p1449_p1) target bundleno = 16 (0x10), region = 102 }
 0x132   : > { %s1575_s24 = smov %s1562_s7 }
 0x133   : > { %s1576_s25 = smov %s1563_s9 }
 0x134   : > { %s1577_s26 = smov %s1564_s6 }
 0x135   :  { %522 = vsyncpa [#allocation3], 1 }
 0x136   :  { %524 = vsyncpa [#allocation3 + $0x1], 1 }
 0x137   :  { %525 = vsyncpa [#allocation6], 1 }
 0x138   :  { %527 = vsyncpa [#allocation6 + $0x1], 1 }
 0x139   :  { %528 = vsyncpa [#allocation4], 1 }
 0x13a   :  { %530 = vsyncpa [#allocation4 + $0x1], 1 }

</bundles_post_ra>
